<compile_context>
chip_gen: v7x
topology: tpu7x:2x2x1
jax: 0.10.0
libtpu: 0.0.40
codegen_flags: <defaults>
</compile_context>

<pallas_src>
import functools

import jax
import jax.numpy as jnp
from jax.experimental import pallas as pl
from jax.experimental.pallas import tpu as pltpu

_MIN_PALLAS_BYTES = 2 * 1024 * 1024     # below this, XLA's fused sigmoid wins
_TARGET_BLOCK_BYTES = 4 * 1024 * 1024   # ~4 MiB blocks (v7x overhead-friendly)


def _sigmoid_kernel(x_ref, o_ref):
    # f32 compute keeps the EUP path correct on v5e (no bf16 EUP); no-op for f32 in.
    x = x_ref[...].astype(jnp.float32)
    # Single EUP transcendental per element (tanh); the VALU mul/add is free
    # filler in this HBM-bound kernel. Matches XLA's own logistic expansion.
    o_ref[...] = (0.5 * jnp.tanh(0.5 * x) + 0.5).astype(o_ref.dtype)


def _choose_feature_tile(n, f, itemsize):
    """Lane tile along the flattened feature axis.

    The batch axis stays a full-extent block dim (legal for any dtype packing),
    so only the last dim must be a multiple of 128 (or the full extent).
    """
    if f % 128 != 0:
        return f                           # whole-array block: full dims always legal
    cap = _TARGET_BLOCK_BYTES // max(1, n * itemsize)
    cap = max(128, (cap // 128) * 128)
    cap = min(cap, f)
    # v7x has 2 TensorCores: make sure the 'parallel' grid axis has >= 2 steps.
    if cap >= f and f >= 256:
        cap = ((f // 128 + 1) // 2) * 128  # ceil(F/2) rounded up to a lane multiple
    # Prefer a tile that divides F exactly (no masked partial store on the tail).
    t = cap
    while t >= 128:
        if f % t == 0:
            return t
        t -= 128
    return cap                             # non-dividing tile; Pallas masks the tail


@functools.partial(jax.jit, static_argnames=("force_pallas",))
def binary_classifier_forward(x, force_pallas=False):
    """Forward of BinaryClassifier: flatten (N, ...) -> (N, F), then sigmoid."""
    n = x.shape[0]
    f = 1
    for d in x.shape[1:]:
        f *= d
    x_flat = x.reshape(n, f)               # nn.Flatten (row-major, matches torch)

    total_bytes = n * f * x.dtype.itemsize
    if not force_pallas and total_bytes < _MIN_PALLAS_BYTES:
        # Tiny inputs: fixed pallas_call/grid setup loses to XLA's fused sigmoid.
        return jax.nn.sigmoid(x_flat)

    tile_f = _choose_feature_tile(n, f, x.dtype.itemsize)

    return pl.pallas_call(
        _sigmoid_kernel,
        out_shape=jax.ShapeDtypeStruct((n, f), x.dtype),
        grid_spec=pltpu.PrefetchScalarGridSpec(
            num_scalar_prefetch=0,
            grid=(pl.cdiv(f, tile_f),),
            in_specs=[pl.BlockSpec((n, tile_f), lambda i: (0, i))],
            out_specs=pl.BlockSpec((n, tile_f), lambda i: (0, i)),
        ),
        compiler_params=pltpu.CompilerParams(
            dimension_semantics=("parallel",),
            # 4 MiB blocks x 2 buffers x (in + out) = 16 MiB: needs a limit above
            # v5e's 16 MiB scoped default; safe on v6e/v7x (64-128 MiB physical).
            vmem_limit_bytes=32 * 1024 * 1024,
        ),
    )(x_flat)


def init_params(key):
    """Deterministic init of the module's parameters (fc1 is unused in forward)."""
    in_features = 128 * 256
    kw, kb = jax.random.split(key)
    bound = 1.0 / jnp.sqrt(in_features)
    w = jax.random.uniform(kw, (1, in_features), jnp.float32, -bound, bound)
    b = jax.random.uniform(kb, (1,), jnp.float32, -bound, bound)
    return {"fc1_w": w, "fc1_b": b}        # unused by forward(), kept for fidelity


if __name__ == "__main__":
    key = jax.random.PRNGKey(0)
    k_params, k_x = jax.random.split(key)

    _ = init_params(k_params)              # built but unused, matching PyTorch forward

    # NCHW input whose flatten is exactly 128*256 features (what fc1 expects):
    # (2, 1, 128, 256) -> (2, 32768). force_pallas=True exercises the Pallas path
    # (2 feature tiles -> 2 grid steps); the default call at this size takes the
    # documented fused-XLA fallback.
    x = jax.random.normal(k_x, (2, 1, 128, 256), dtype=jnp.float32)
    ref = jax.nn.sigmoid(x.reshape(2, -1))

    y = jax.block_until_ready(binary_classifier_forward(x, force_pallas=True))
    assert y.shape == (2, 128 * 256)
    assert y.dtype == x.dtype
    assert jnp.allclose(y, ref, atol=1e-6, rtol=1e-6)

    y_default = jax.block_until_ready(binary_classifier_forward(x))
    assert jnp.allclose(y_default, ref, atol=1e-6, rtol=1e-6)

    # Even smaller shape, still through the Pallas path (full-batch blocks, 2 tiles).
    x_small = jax.random.normal(k_x, (2, 4, 16, 16), dtype=jnp.float32)
    y_small = jax.block_until_ready(
        binary_classifier_forward(x_small, force_pallas=True)
    )
    assert jnp.allclose(
        y_small, jax.nn.sigmoid(x_small.reshape(2, -1)), atol=1e-6, rtol=1e-6
    )

    print("KERNEL_OK")
</pallas_src>

<mosaic_0001>
module attributes {stable_mosaic.version = 11 : i64} {
  func.func @_sigmoid_kernel(%arg0: i32, %arg1: memref<2x16384xf32, #tpu.memory_space<vmem>>, %arg2: memref<2x16384xf32, #tpu.memory_space<vmem>>) attributes {dimension_semantics = [#tpu.dimension_semantics<parallel>], iteration_bounds = array<i64: 2>, scalar_prefetch = 0 : i64, scratch_operands = 0 : i64, tpu.core_type = #tpu.core_type<tc>, window_params = [{transform_indices = @transform_0, window_bounds = array<i64: 2, 16384>}, {transform_indices = @transform_1, window_bounds = array<i64: 2, 16384>}]} {
    %c0 = arith.constant 0 : index
    %c0_0 = arith.constant 0 : index
    %0 = vector.load %arg1[%c0, %c0_0] : memref<2x16384xf32, #tpu.memory_space<vmem>>, vector<2x16384xf32>
    %cst = arith.constant 5.000000e-01 : f32
    %1 = vector.broadcast %cst : f32 to vector<2x16384xf32>
    %2 = arith.mulf %1, %0 : vector<2x16384xf32>
    %3 = math.tanh %2 : vector<2x16384xf32>
    %cst_1 = arith.constant 5.000000e-01 : f32
    %4 = vector.broadcast %cst_1 : f32 to vector<2x16384xf32>
    %5 = arith.mulf %4, %3 : vector<2x16384xf32>
    %cst_2 = arith.constant 5.000000e-01 : f32
    %6 = vector.broadcast %cst_2 : f32 to vector<2x16384xf32>
    %7 = arith.addf %5, %6 : vector<2x16384xf32>
    %c0_3 = arith.constant 0 : index
    %c0_4 = arith.constant 0 : index
    %8 = vector.load %arg2[%c0_3, %c0_4] : memref<2x16384xf32, #tpu.memory_space<vmem>>, vector<2x16384xf32>
    tpu.vector_store %arg2[%c0_3, %c0_4], %7 {strides = array<i32>} : memref<2x16384xf32, #tpu.memory_space<vmem>>, vector<2x16384xf32>,
    return
  }
  func.func @transform_0(%arg0: i32) -> (i32, i32) {
    %c0_i32 = arith.constant 0 : i32
    %c0_i32_0 = arith.constant 0 : i32
    return %c0_i32, %arg0 : i32, i32
  }
  func.func @transform_1(%arg0: i32) -> (i32, i32) {
    %c0_i32 = arith.constant 0 : i32
    %c0_i32_0 = arith.constant 0 : i32
    return %c0_i32, %arg0 : i32, i32
  }
}

</mosaic_0001>

<bundles_post_ra>
// kernel: binary_classifier_forward.1
= control target key start
LH: loop header
LB: loop body
LE: loop exit
PB: predicated region body
PF: predicated region fallthrough
CT: control target
= control target key end

     0   :  { %6 = vsyncpa [#allocation3], 0  ;;  %s750_s0 = inlined_call_operand.vmem [shape: f32[2,32768], index: 0, kind: input, shape index: {}]   ;;  %s751_s1 = inlined_call_operand.hbm [shape: f32[2,32768], index: 1, kind: output, shape index: {}]  }
   0x1   :  { %8 = vsyncpa [#allocation3 + $0x1], 0  ;;  %s575_s6 = smov 0   ;;  %s577_s7 = smov 0  }
   0x2   :  { %s579_s8 = smov 0   ;;  %s581_s9 = smov 0  }
   0x3 LB: > { %s596_s10 = sadd.s32 4294967295, %s562_s9   ;;  %s384_s11 = sadd.s32 4294967294, %s562_s9   ;;  %s562_s9 = sphi %s581_s9, %s757_s9   ;;  %s558_s8 = sphi %s579_s8, %s756_s8   ;;  %s554_s7 = sphi %s577_s7, %s755_s7   ;;  %s550_s6 = sphi %s575_s6, %s754_s6  }
   0x4   : > { %s600_s12 = sadd.s32 1, %s562_s9   ;;  %s47_s13 = sadd.s32 1, %s558_s8 }
   0x5   : > { %s44_s14 = ssub.s32 %s562_s9, %s600_s12  ;;  %p57_p0 = scmp.ne.s32.totalorder %s558_s8, %s554_s7 }
   0x6   : > { %p45_p1 = scmp.eq.s32.totalorder %s44_s14, 0  ;;  %p58_p2 = scmp.eq.s32.totalorder %s596_s10, 1 }
   0x7   : > { %p63_p3 = scmp.ne.s32.totalorder %s554_s7, %s550_s6  ;;  %p64_p4 = scmp.eq.s32.totalorder %s384_s11, 1 }
   0x8   : > { %s611_s15 = scalar_select %p45_p1, %s558_s8, %s47_s13  }
   0x9   : > { %p613_p5 = por %p58_p2, %p57_p0  ;;  %p617_p6 = por %p64_p4, %p63_p3 }
   0xa   : > { %p387_p7 = scmp.ge.s32.totalorder %s562_s9, 1  ;;  %p91_p8 = scmp.lt.s32.totalorder %s562_s9, 3 }
   0xc   : > { %p92_p9 = pnand %p387_p7, %p91_p8 }
   0xd   : > { %s389_s18 = sshll.u32 (!%p92_p9), %s596_s10, 7  ;;  %s108_s23 = sand.u32 (!%p92_p9), 1, %s554_s7  }
   0xe   : > { %95 = sbr.rel (%p92_p9) target bundleno = 87 (0x57), region = 24  ;;  %p112_p10 = scmp.lt.s32.totalorder (!%p92_p9), %s389_s18, 255 }
   0xf   : > { %s648_s24 = sshll.u32 (!%p92_p9), %s108_s23, 8  ;;  %s396_s26 = sshll.u32 (!%p92_p9), %s596_s10, 12 }
  0x10   : > { %s657_s25 = scalar_lea.vmem (!%p92_p9), [#allocation2], %s648_s24  ;;  %s704_s30 = scalar_lea.hbm (!%p92_p9), %s751_s1, %s396_s26 }
  0x11   : > { %s325_s27 = sshll.u32 (!%p92_p9), %s657_s25, 4  ;;  %s311_s2 = scalar_lea.sflag (!%p92_p9), [#allocation3], %s108_s23  ;;  %s706_s27 = int_to_ptr.vmem [resolvable:$true] %s325_s27 }
  0x12   : > { %s500_s3 = scalar_lea.vmem (!%p92_p9), %s706_s27, 4096  ;;  %s564_s4 = smov (!%p92_p9), [#allocation2]  }
  0x13   : > { %p501_p11 = scmp.ne.s32.totalorder (!%p92_p9), %s706_s27, %s500_s3  ;;  %s504_s5 = sshll.u32 (!%p92_p9), %s564_s4, 4  ;;  %s505_s5 = int_to_ptr.vmem [resolvable:$false] %s504_s5 }
  0x14   : > { %s506_s10 = scalar_lea.vmem (!%p92_p9), %s505_s5, 8192  ;;  %p507_p0 = scmp.lt.s32.totalorder (!%p92_p9), %s706_s27, %s505_s5 }
  0x15   : > { %s759_s18 = smov (!%p112_p10, %s389_s18), 255  ;;  %p502_p12 = pnand %p501_p11, %p613_p5 }
  0x16   : > { %s390_s19 = sshll.u32 %s759_s18, 1  ;;  %p508_p1 = scmp.lt.s32.totalorder %s506_s10, %s500_s3 }
  0x17   : > { %s627_s22 = scalar_lea.vmem %s750_s0, %s390_s19  ;;  %p503_p13 = pneg %p502_p12 }
  0x18   : > { %v118_v0 = vld [vmem:[%s627_s22] sm:$0xff]  ;;  %v119_v1 = vld [vmem:[%s627_s22 + $0x8] sm:$0xff]  ;;  %v120_v2 = vld [vmem:[%s627_s22 + $0x10] sm:$0xff]  ;;  %p509_p2 = por %p508_p1, %p507_p0 }
  0x19   : > { %v150_v3 = vmul.f32 0.5, %v118_v0  ;;  %v151_v4 = vmul.f32 0.5, %v119_v1  ;;  %v152_v5 = vmul.f32 0.5, %v120_v2  ;;  %v121_v6 = vld [vmem:[%s627_s22 + $0x18] sm:$0xff]  ;;  %v122_v7 = vld [vmem:[%s627_s22 + $0x20] sm:$0xff]  ;;  %v123_v8 = vld [vmem:[%s627_s22 + $0x28] sm:$0xff] }
  0x1a   : > { %v153_v9 = vmul.f32 0.5, %v121_v6  ;;  %v124_v10 = vld [vmem:[%s627_s22 + $0x30] sm:$0xff]  ;;  %v154_v11 = vmul.f32 0.5, %v122_v7  ;;  %v125_v12 = vld [vmem:[%s627_s22 + $0x38] sm:$0xff]  ;;  %v155_v13 = vmul.f32 0.5, %v123_v8  ;;  %v126_v14 = vld [vmem:[%s627_s22 + $0x40] sm:$0xff]  ;;  %p510_p3 = pnand %p509_p2, %p503_p13 }
  0x1b   : > { %436 = vtanh.f32 %v150_v3  ;;  %v156_v15 = vmul.f32 0.5, %v124_v10  ;;  %v127_v16 = vld [vmem:[%s627_s22 + $0x48] sm:$0xff]  ;;  %v157_v17 = vmul.f32 0.5, %v125_v12  ;;  %v128_v18 = vld [vmem:[%s627_s22 + $0x50] sm:$0xff]  ;;  %v158_v19 = vmul.f32 0.5, %v126_v14  ;;  %v129_v20 = vld [vmem:[%s627_s22 + $0x58] sm:$0xff] }
  0x1c   : > { %438 = vtanh.f32 %v151_v4  ;;  %v159_v21 = vmul.f32 0.5, %v127_v16  ;;  %v130_v22 = vld [vmem:[%s627_s22 + $0x60] sm:$0xff]  ;;  %v160_v23 = vmul.f32 0.5, %v128_v18  ;;  %v131_v24 = vld [vmem:[%s627_s22 + $0x68] sm:$0xff]  ;;  %v161_v25 = vmul.f32 0.5, %v129_v20  ;;  %v132_v26 = vld [vmem:[%s627_s22 + $0x70] sm:$0xff] }
  0x1d   : > { %440 = vtanh.f32 %v152_v5  ;;  %v162_v27 = vmul.f32 0.5, %v130_v22  ;;  %v133_v28 = vld [vmem:[%s627_s22 + $0x78] sm:$0xff]  ;;  %v163_v29 = vmul.f32 0.5, %v131_v24  ;;  %v134_v30 = vld [vmem:[%s627_s22 + $0x80] sm:$0xff]  ;;  %v164_v32 = vmul.f32 0.5, %v132_v26  ;;  %v135_v33 = vld [vmem:[%s627_s22 + $0x88] sm:$0xff] }
  0x1e   : > { %442 = vtanh.f32 %v153_v9  ;;  %v165_v36 = vmul.f32 0.5, %v133_v28  ;;  %v136_v37 = vld [vmem:[%s627_s22 + $0x90] sm:$0xff]  ;;  %v166_v40 = vmul.f32 0.5, %v134_v30  ;;  %v137_v41 = vld [vmem:[%s627_s22 + $0x98] sm:$0xff]  ;;  %v167_v45 = vmul.f32 0.5, %v135_v33  ;;  %v138_v46 = vld [vmem:[%s627_s22 + $0xa0] sm:$0xff] }
  0x1f   : > { %444 = vtanh.f32 %v154_v11  ;;  %v168_v50 = vmul.f32 0.5, %v136_v37  ;;  %v139_v51 = vld [vmem:[%s627_s22 + $0xa8] sm:$0xff]  ;;  %v169_v55 = vmul.f32 0.5, %v137_v41  ;;  %v140_v56 = vld [vmem:[%s627_s22 + $0xb0] sm:$0xff]  ;;  %v170_v60 = vmul.f32 0.5, %v138_v46  ;;  %v141_v61 = vld [vmem:[%s627_s22 + $0xb8] sm:$0xff] }
  0x20   : > { %446 = vtanh.f32 %v155_v13  ;;  %v171_v1 = vmul.f32 0.5, %v139_v51  ;;  %v142_v2 = vld [vmem:[%s627_s22 + $0xc0] sm:$0xff]  ;;  %v172_v6 = vmul.f32 0.5, %v140_v56  ;;  %v143_v7 = vld [vmem:[%s627_s22 + $0xc8] sm:$0xff]  ;;  %v173_v11 = vmul.f32 0.5, %v141_v61  ;;  %v144_v12 = vld [vmem:[%s627_s22 + $0xd0] sm:$0xff] }
  0x21   : > { %448 = vtanh.f32 %v156_v15  ;;  %v174_v16 = vmul.f32 0.5, %v142_v2  ;;  %v146_v22 = vld [vmem:[%s627_s22 + $0xe0] sm:$0xff]  ;;  %v176_v26 = vmul.f32 0.5, %v144_v12  ;;  %v149_v37 = vld [vmem:[%s627_s22 + $0xf8] sm:$0xff] }
  0x22   : > { %450 = vtanh.f32 %v157_v17  ;;  %v145_v17 = vld [vmem:[%s627_s22 + $0xd8] sm:$0xff] }
  0x23   : > { %452 = vtanh.f32 %v158_v19 }
  0x24   : > { %454 = vtanh.f32 %v159_v21  ;;  %v175_v21 = vmul.f32 0.5, %v143_v7 }
  0x25   : > { %v437_v31 = vpop.eup %436  ;;  %456 = vtanh.f32 %v160_v23 }
  0x26   : > { %v439_v34 = vpop.eup %438  ;;  %v214_v35 = vmul.f32 0.5, %v437_v31  ;;  %458 = vtanh.f32 %v161_v25  ;;  %v177_v31 = vmul.f32 0.5, %v145_v17 }
  0x27   : > { %v441_v38 = vpop.eup %440  ;;  %v215_v39 = vmul.f32 0.5, %v439_v34  ;;  %460 = vtanh.f32 %v162_v27  ;;  %v147_v27 = vld [vmem:[%s627_s22 + $0xe8] sm:$0xff] }
  0x28   : > { %v443_v42 = vpop.eup %442  ;;  %v246_v43 = vadd.f32 0.5, %v214_v35  ;;  %v216_v44 = vmul.f32 0.5, %v441_v38  ;;  %462 = vtanh.f32 %v163_v29  ;;  %v179_v41 = vmul.f32 0.5, %v147_v27 }
  0x29   : > { %v445_v47 = vpop.eup %444  ;;  %v247_v48 = vadd.f32 0.5, %v215_v39  ;;  %v217_v49 = vmul.f32 0.5, %v443_v42  ;;  %464 = vtanh.f32 %v164_v32  ;;  %v148_v32 = vld [vmem:[%s627_s22 + $0xf0] sm:$0xff] }
  0x2a   : > { %v447_v52 = vpop.eup %446  ;;  %278 = vst [vmem:[%s657_s25] sm:$0xff] %v246_v43  ;;  %v248_v53 = vadd.f32 0.5, %v216_v44  ;;  %v218_v54 = vmul.f32 0.5, %v445_v47  ;;  %466 = vtanh.f32 %v165_v36  ;;  %v178_v36 = vmul.f32 0.5, %v146_v22 }
  0x2b   : > { %v449_v57 = vpop.eup %448  ;;  %279 = vst [vmem:[%s657_s25 + $0x8] sm:$0xff] %v247_v48  ;;  %v249_v58 = vadd.f32 0.5, %v217_v49  ;;  %v219_v59 = vmul.f32 0.5, %v447_v52  ;;  %468 = vtanh.f32 %v166_v40  ;;  %v181_v49 = vmul.f32 0.5, %v149_v37 }
  0x2c   : > { %v451_v62 = vpop.eup %450  ;;  %280 = vst [vmem:[%s657_s25 + $0x10] sm:$0xff] %v248_v53  ;;  %v250_v63 = vadd.f32 0.5, %v218_v54  ;;  %v220_v0 = vmul.f32 0.5, %v449_v57  ;;  %470 = vtanh.f32 %v167_v45  ;;  %v180_v45 = vmul.f32 0.5, %v148_v32 }
  0x2d   : > { %v453_v3 = vpop.eup %452  ;;  %281 = vst [vmem:[%s657_s25 + $0x18] sm:$0xff] %v249_v58  ;;  %v251_v4 = vadd.f32 0.5, %v219_v59  ;;  %v221_v5 = vmul.f32 0.5, %v451_v62  ;;  %472 = vtanh.f32 %v168_v50 }
  0x2e   : > { %v455_v8 = vpop.eup %454  ;;  %282 = vst [vmem:[%s657_s25 + $0x20] sm:$0xff] %v250_v63  ;;  %v252_v9 = vadd.f32 0.5, %v220_v0  ;;  %v222_v10 = vmul.f32 0.5, %v453_v3  ;;  %474 = vtanh.f32 %v169_v55 }
  0x2f   : > { %v457_v13 = vpop.eup %456  ;;  %283 = vst [vmem:[%s657_s25 + $0x28] sm:$0xff] %v251_v4  ;;  %v253_v14 = vadd.f32 0.5, %v221_v5  ;;  %v223_v15 = vmul.f32 0.5, %v455_v8  ;;  %476 = vtanh.f32 %v170_v60 }
  0x30   : > { %v459_v18 = vpop.eup %458  ;;  %284 = vst [vmem:[%s657_s25 + $0x30] sm:$0xff] %v252_v9  ;;  %v254_v19 = vadd.f32 0.5, %v222_v10  ;;  %v224_v20 = vmul.f32 0.5, %v457_v13  ;;  %478 = vtanh.f32 %v171_v1 }
  0x31   : > { %v461_v23 = vpop.eup %460  ;;  %285 = vst [vmem:[%s657_s25 + $0x38] sm:$0xff] %v253_v14  ;;  %v255_v24 = vadd.f32 0.5, %v223_v15  ;;  %v225_v25 = vmul.f32 0.5, %v459_v18  ;;  %480 = vtanh.f32 %v172_v6 }
  0x32   : > { %v463_v28 = vpop.eup %462  ;;  %286 = vst [vmem:[%s657_s25 + $0x40] sm:$0xff] %v254_v19  ;;  %v256_v29 = vadd.f32 0.5, %v224_v20  ;;  %v226_v30 = vmul.f32 0.5, %v461_v23  ;;  %482 = vtanh.f32 %v173_v11 }
  0x33   : > { %v465_v33 = vpop.eup %464  ;;  %287 = vst [vmem:[%s657_s25 + $0x48] sm:$0xff] %v255_v24  ;;  %v257_v34 = vadd.f32 0.5, %v225_v25  ;;  %v227_v35 = vmul.f32 0.5, %v463_v28  ;;  %484 = vtanh.f32 %v174_v16 }
  0x34   : > { %v467_v38 = vpop.eup %466  ;;  %288 = vst [vmem:[%s657_s25 + $0x50] sm:$0xff] %v256_v29  ;;  %v258_v39 = vadd.f32 0.5, %v226_v30  ;;  %v228_v40 = vmul.f32 0.5, %v465_v33  ;;  %486 = vtanh.f32 %v175_v21 }
  0x35   : > { %v469_v42 = vpop.eup %468  ;;  %289 = vst [vmem:[%s657_s25 + $0x58] sm:$0xff] %v257_v34  ;;  %v259_v43 = vadd.f32 0.5, %v227_v35  ;;  %v229_v44 = vmul.f32 0.5, %v467_v38  ;;  %488 = vtanh.f32 %v176_v26 }
  0x36   : > { %v471_v46 = vpop.eup %470  ;;  %290 = vst [vmem:[%s657_s25 + $0x60] sm:$0xff] %v258_v39  ;;  %v260_v47 = vadd.f32 0.5, %v228_v40  ;;  %v230_v48 = vmul.f32 0.5, %v469_v42  ;;  %490 = vtanh.f32 %v177_v31 }
  0x37   : > { %v473_v50 = vpop.eup %472  ;;  %291 = vst [vmem:[%s657_s25 + $0x68] sm:$0xff] %v259_v43  ;;  %v261_v51 = vadd.f32 0.5, %v229_v44  ;;  %v231_v52 = vmul.f32 0.5, %v471_v46  ;;  %492 = vtanh.f32 %v178_v36 }
  0x38   : > { %v475_v53 = vpop.eup %474  ;;  %292 = vst [vmem:[%s657_s25 + $0x70] sm:$0xff] %v260_v47  ;;  %v262_v54 = vadd.f32 0.5, %v230_v48  ;;  %v232_v55 = vmul.f32 0.5, %v473_v50  ;;  %494 = vtanh.f32 %v179_v41 }
  0x39   : > { %v477_v56 = vpop.eup %476  ;;  %293 = vst [vmem:[%s657_s25 + $0x78] sm:$0xff] %v261_v51  ;;  %v263_v57 = vadd.f32 0.5, %v231_v52  ;;  %v233_v58 = vmul.f32 0.5, %v475_v53  ;;  %496 = vtanh.f32 %v180_v45 }
  0x3a   : > { %v479_v59 = vpop.eup %478  ;;  %294 = vst [vmem:[%s657_s25 + $0x80] sm:$0xff] %v262_v54  ;;  %v264_v60 = vadd.f32 0.5, %v232_v55  ;;  %v234_v61 = vmul.f32 0.5, %v477_v56  ;;  %498 = vtanh.f32 %v181_v49 }
  0x3b   : > { %v481_v62 = vpop.eup %480  ;;  %295 = vst [vmem:[%s657_s25 + $0x88] sm:$0xff] %v263_v57  ;;  %v265_v63 = vadd.f32 0.5, %v233_v58  ;;  %v235_v0 = vmul.f32 0.5, %v479_v59 }
  0x3c   : > { %v483_v1 = vpop.eup %482  ;;  %296 = vst [vmem:[%s657_s25 + $0x90] sm:$0xff] %v264_v60  ;;  %v266_v2 = vadd.f32 0.5, %v234_v61  ;;  %v236_v3 = vmul.f32 0.5, %v481_v62 }
  0x3d   : > { %v485_v4 = vpop.eup %484  ;;  %297 = vst [vmem:[%s657_s25 + $0x98] sm:$0xff] %v265_v63  ;;  %v267_v5 = vadd.f32 0.5, %v235_v0  ;;  %v237_v6 = vmul.f32 0.5, %v483_v1 }
  0x3e   : > { %v487_v7 = vpop.eup %486  ;;  %298 = vst [vmem:[%s657_s25 + $0xa0] sm:$0xff] %v266_v2  ;;  %v268_v8 = vadd.f32 0.5, %v236_v3  ;;  %v238_v9 = vmul.f32 0.5, %v485_v4 }
  0x3f   : > { %v489_v10 = vpop.eup %488  ;;  %299 = vst [vmem:[%s657_s25 + $0xa8] sm:$0xff] %v267_v5  ;;  %v269_v11 = vadd.f32 0.5, %v237_v6  ;;  %v239_v12 = vmul.f32 0.5, %v487_v7 }
  0x40   : > { %v491_v13 = vpop.eup %490  ;;  %300 = vst [vmem:[%s657_s25 + $0xb0] sm:$0xff] %v268_v8  ;;  %v270_v14 = vadd.f32 0.5, %v238_v9  ;;  %v240_v15 = vmul.f32 0.5, %v489_v10 }
  0x41   : > { %v493_v16 = vpop.eup %492  ;;  %301 = vst [vmem:[%s657_s25 + $0xb8] sm:$0xff] %v269_v11  ;;  %v271_v17 = vadd.f32 0.5, %v239_v12  ;;  %v241_v18 = vmul.f32 0.5, %v491_v13 }
  0x42   : > { %v495_v19 = vpop.eup %494  ;;  %302 = vst [vmem:[%s657_s25 + $0xc0] sm:$0xff] %v270_v14  ;;  %v272_v20 = vadd.f32 0.5, %v240_v15  ;;  %v242_v21 = vmul.f32 0.5, %v493_v16 }
  0x43   : > { %v497_v22 = vpop.eup %496  ;;  %303 = vst [vmem:[%s657_s25 + $0xc8] sm:$0xff] %v271_v17  ;;  %v273_v23 = vadd.f32 0.5, %v241_v18  ;;  %v243_v24 = vmul.f32 0.5, %v495_v19 }
  0x44   : > { %v499_v25 = vpop.eup %498  ;;  %304 = vst [vmem:[%s657_s25 + $0xd0] sm:$0xff] %v272_v20  ;;  %v274_v26 = vadd.f32 0.5, %v242_v21  ;;  %v244_v27 = vmul.f32 0.5, %v497_v22 }
  0x45   : > { %305 = vst [vmem:[%s657_s25 + $0xd8] sm:$0xff] %v273_v23  ;;  %v275_v28 = vadd.f32 0.5, %v243_v24  ;;  %v245_v29 = vmul.f32 0.5, %v499_v25 }
  0x46   : > { %306 = vst [vmem:[%s657_s25 + $0xe0] sm:$0xff] %v274_v26  ;;  %v276_v30 = vadd.f32 0.5, %v244_v27 }
  0x47   : > { %307 = vst [vmem:[%s657_s25 + $0xe8] sm:$0xff] %v275_v28  ;;  %v277_v31 = vadd.f32 0.5, %v245_v29 }
  0x48   : > { %308 = vst [vmem:[%s657_s25 + $0xf0] sm:$0xff] %v276_v30 }
  0x49   : > { %309 = vst [vmem:[%s657_s25 + $0xf8] sm:$0xff] %v277_v31 }
  0x4a   : > { %513 = shalt.err (!%p510_p3)
}
  0x4b   : > { %s514_s11 = scalar_lea.hbm %s704_s30, 4096  ;;  %s518_s18 = scalar_lea.hbm %s751_s1, 8192 }
  0x4c   : > { %p515_p4 = scmp.ne.s32.totalorder %s704_s30, %s514_s11  ;;  %p519_p9 = scmp.lt.u32.totalorder %s704_s30, %s751_s1 }
  0x4d   : > { %p520_p10 = scmp.lt.u32.totalorder %s518_s18, %s514_s11  ;;  %p522_p12 = scmp.lt.u32.totalorder %s514_s11, %s704_s30 }
  0x4e   : > { %p516_p7 = pnand %p515_p4, %p613_p5 }
  0x4f   : > { %p521_p11 = por %p520_p10, %p519_p9 }
  0x50   : > { %p517_p8 = pneg %p516_p7 }
  0x51   : > { %p523_p13 = por %p522_p12, %p521_p11 }
  0x53   : > { %p524_p0 = pnand %p523_p13, %p517_p8 }
  0x55   : > { %527 = shalt.err (!%p524_p0)
}
  0x56   : > { %397 = dma.vmem_to_hbm [thread:$0]  (%p613_p5), %s706_s27, 4096, %s704_s30, %s311_s2  }
  0x57 PF: > { %p403_p1 = scmp.ge.s32.totalorder %s562_s9, 2  ;;  %s337_s21 = sand.u32 1, %s550_s6  }
  0x58   : > { %s338_s22 = scalar_lea.sflag [#allocation3], %s337_s21 }
  0x59   : > { %p400_p2 = pnand %p403_p1, %p617_p6 }
  0x5b   : > { %545 = dma.done.wait (!%p400_p2), %s338_s22, 4096  }
  0x5c   : > { %547 = vsyncadd (!%p400_p2), %s338_s22, 4294963200  ;;  %p11_p3 = scmp.ge.s32.totalorder %s600_s12, 4   ;;  %s754_s6 = smov %s554_s7 }
  0x5d   : > { %s755_s7 = smov %s558_s8  ;;  %s756_s8 = smov %s611_s15 }
  0x5e   : > { %s757_s9 = smov %s600_s12  ;;  %13 = sbr.rel (!%p11_p3) target bundleno = 3 (0x3), region = 59 }
  0x65   :  { %343 = vsyncpa [#allocation3], 1 }
  0x66   :  { %345 = vsyncpa [#allocation3 + $0x1], 1 }

</bundles_post_ra>
